<compile_context>
chip_gen: v5e
topology: v5e:2x2
jax: 0.10.0
libtpu: 0.0.40
codegen_flags: <defaults>
</compile_context>

<pallas_src>
import functools

import jax
import jax.numpy as jnp
from jax import lax
from jax.experimental import pallas as pl
from jax.experimental.pallas import tpu as pltpu


# ---------------- helpers ----------------

def _round_up(x, m):
    return ((x + m - 1) // m) * m


def _pick_tile(n, candidates):
    for t in candidates:
        if n >= t and n % t == 0:
            return t
    return n  # full extent is always a legal block dim


def _fp8_roundtrip_f32(x):
    # FP8Manager.quantize -> dequantize round-trip (fp8 e4m3 values are exact
    # in f32/bf16).
    return x.astype(jnp.float8_e4m3fn).astype(jnp.float32)


def _vmem_limit(block_bytes):
    # double-buffered blocks + headroom; clamp to v7x physical VMEM (64 MiB).
    return int(min(64 * 2 ** 20, max(32 * 2 ** 20, 3 * block_bytes)))


# ---------------- stage A kernel: fused QKV projection ----------------
# grid = (B, S//tr_a, H); h innermost so the x blocks (index-invariant over h)
# stay resident and are DMAed once per (b, si).

def _qkv_proj_kernel(xq_ref, xk_ref, xv_ref,
                     wq_ref, wk_ref, wv_ref,
                     bq_ref, bk_ref, bv_ref,
                     q_ref, k_ref, v_ref):
    q = jnp.dot(xq_ref[0], wq_ref[0], preferred_element_type=jnp.float32) + bq_ref[0]
    k = jnp.dot(xk_ref[0], wk_ref[0], preferred_element_type=jnp.float32) + bk_ref[0]
    v = jnp.dot(xv_ref[0], wv_ref[0], preferred_element_type=jnp.float32) + bv_ref[0]
    q_ref[0, 0] = q.astype(q_ref.dtype)
    k_ref[0, 0] = k.astype(k_ref.dtype)
    v_ref[0, 0] = v.astype(v_ref.dtype)


# ---------------- stage B kernel: flash attention ----------------
# grid = (B, H, S//tq, S//tk).  q is pre-scaled (inv_scale folded into W_Q).

def _flash_attn_kernel(q_ref, k_ref, v_ref, z_ref,
                       m_ref, l_ref, acc_ref,
                       *, tq, tk, ignore_val):
    qi = pl.program_id(2)
    ki = pl.program_id(3)
    nk = pl.num_programs(3)

    @pl.when(ki == 0)
    def _init():
        # large finite negative (not -inf) so a hypothetical fully-masked first
        # block cannot produce 0*inf NaNs.
        m_ref[...] = jnp.full(m_ref.shape, -1e30, m_ref.dtype)
        l_ref[...] = jnp.zeros(l_ref.shape, l_ref.dtype)
        acc_ref[...] = jnp.zeros(acc_ref.shape, acc_ref.dtype)

    def update(masked):
        q = q_ref[0, 0]                        # (tq, d_head) bf16, pre-scaled
        k = k_ref[0, 0]                        # (tk, d_head) bf16
        s = lax.dot_general(q, k, (((1,), (1,)), ((), ())),
                            preferred_element_type=jnp.float32)   # (tq, tk) f32
        if masked:   # only diagonal-crossing blocks pay for the mask build
            qpos = qi * tq + lax.broadcasted_iota(jnp.int32, (tq, tk), 0)
            kpos = ki * tk + lax.broadcasted_iota(jnp.int32, (tq, tk), 1)
            s = jnp.where(kpos <= qpos, s, jnp.float32(ignore_val))
        m_prev = m_ref[...]                                       # (tq, 1)
        m_new = jnp.maximum(m_prev, jnp.max(s, axis=-1, keepdims=True))
        alpha = jnp.exp(m_prev - m_new)
        p = jnp.exp(s - m_new)                                    # (tq, tk) f32
        l_ref[...] = alpha * l_ref[...] + jnp.sum(p, axis=-1, keepdims=True)
        acc_ref[...] = alpha * acc_ref[...] + jnp.dot(
            p.astype(jnp.bfloat16), v_ref[0, 0],
            preferred_element_type=jnp.float32)
        m_ref[...] = m_new

    # Strictly below the diagonal (tq == tk): mask is all-true, skip building it.
    @pl.when(ki < qi)
    def _full_block():
        update(masked=False)

    # Diagonal block: apply the causal mask.
    @pl.when(ki == qi)
    def _diag_block():
        update(masked=True)

    # Above-diagonal blocks (ki > qi) contribute nothing and (thanks to the
    # clamped kv index_map) issue no DMA.

    @pl.when(ki == nk - 1)
    def _finalize():
        inv_l = pl.reciprocal(l_ref[...], approx=True)   # EUP slot, ~free
        z_ref[0, 0] = (acc_ref[...] * inv_l).astype(z_ref.dtype)


# ---------------- stage C kernel: output projection, head reduction ----------------
# grid = (B, S//tr_c, dm_pad//tn_c, H); h is an "arbitrary" reduction axis
# accumulating directly into the resident f32 output block.

def _out_proj_kernel(z_ref, wo_ref, bo_ref, o_ref):
    h = pl.program_id(3)

    @pl.when(h == 0)
    def _init():
        o_ref[0] = jnp.broadcast_to(bo_ref[...], o_ref.shape[1:])

    o_ref[0] += jnp.dot(z_ref[0, 0], wo_ref[0],
                        preferred_element_type=jnp.float32)


# ---------------- wrapper ----------------

def attention_forward(query_input, key_input, value_input,
                      W_Q, W_K, W_V, W_O, b_Q, b_K, b_V, b_O,
                      *, use_attn_scale=True):
    """query/key/value_input: (B, S, d_model) f32.
    W_Q/W_K/W_V: (H, d_model, d_head); W_O: (H, d_head, d_model);
    b_Q/b_K/b_V: (H, d_head); b_O: (d_model,)."""
    B, S, d_model = query_input.shape
    H, _, d_head = W_Q.shape
    attn_scale = float(d_head) ** 0.5 if use_attn_scale else 1.0
    inv_scale = 1.0 / attn_scale

    dm_pad = _round_up(d_model, 128)      # lane-dense activations / final output

    # --- host-side packing: fp8 round-trip -> bf16, zero-pad d_model to 128.
    def prep_x(x):
        x8 = _fp8_roundtrip_f32(x).astype(jnp.bfloat16)
        return jnp.pad(x8, ((0, 0), (0, 0), (0, dm_pad - d_model)))   # (B,S,dm_pad)

    def prep_w_qkv(W, scale=1.0):
        w8 = (_fp8_roundtrip_f32(W) * scale).astype(jnp.bfloat16)
        return jnp.pad(w8, ((0, 0), (0, dm_pad - d_model), (0, 0)))   # (H,dm_pad,dh)

    def prep_b_qkv(b, scale=1.0):
        return (b.astype(jnp.float32) * scale).reshape(H, 1, d_head)  # (H,1,dh) f32

    xq, xk, xv = prep_x(query_input), prep_x(key_input), prep_x(value_input)
    # Fold 1/attn_scale into the Q projection so the flash kernel does no scaling.
    wq, wk, wv = prep_w_qkv(W_Q, inv_scale), prep_w_qkv(W_K), prep_w_qkv(W_V)
    bq, bk, bv = prep_b_qkv(b_Q, inv_scale), prep_b_qkv(b_K), prep_b_qkv(b_V)
    # W_O / b_O stay f32 (matches reference numerics).
    wo = jnp.pad(W_O.astype(jnp.float32), ((0, 0), (0, 0), (0, dm_pad - d_model)))
    bo = jnp.pad(b_O.astype(jnp.float32), (0, dm_pad - d_model)).reshape(1, dm_pad)

    # ---------------- stage A: fused QKV projection ----------------
    tr_a = _pick_tile(S, (256, 128, 64, 32, 16, 8))
    x_spec = pl.BlockSpec((1, tr_a, dm_pad), lambda b, si, h: (b, si, 0))
    w_spec = pl.BlockSpec((1, dm_pad, d_head), lambda b, si, h: (h, 0, 0))
    bias_spec = pl.BlockSpec((1, 1, d_head), lambda b, si, h: (h, 0, 0))
    qkv_out_spec = pl.BlockSpec((1, 1, tr_a, d_head), lambda b, si, h: (b, h, si, 0))
    qkv_shape = jax.ShapeDtypeStruct((B, H, S, d_head), jnp.bfloat16)

    bytes_a = (3 * tr_a * dm_pad * 2 + 3 * dm_pad * d_head * 2
               + 3 * d_head * 4 + 3 * tr_a * d_head * 2)

    q_all, k_all, v_all = pl.pallas_call(
        _qkv_proj_kernel,
        out_shape=(qkv_shape, qkv_shape, qkv_shape),
        grid=(B, S // tr_a, H),
        in_specs=[x_spec, x_spec, x_spec, w_spec, w_spec, w_spec,
                  bias_spec, bias_spec, bias_spec],
        out_specs=(qkv_out_spec, qkv_out_spec, qkv_out_spec),
        compiler_params=pltpu.CompilerParams(
            dimension_semantics=("parallel", "parallel", "arbitrary"),
            vmem_limit_bytes=_vmem_limit(bytes_a)),
    )(xq, xk, xv, wq, wk, wv, bq, bk, bv)

    # ---------------- stage B: flash attention ----------------
    # tq capped at 128; tq == tk (the block-skip / diag-mask logic relies on it).
    tq = _pick_tile(S, (128, 64, 32, 16, 8))
    tk = tq
    kernel_b = functools.partial(_flash_attn_kernel, tq=tq, tk=tk,
                                 ignore_val=-1000.0)
    q_spec = pl.BlockSpec((1, 1, tq, d_head), lambda b, h, qi, ki: (b, h, qi, 0))
    # Clamp above-diagonal kv blocks onto the already-resident diagonal block so
    # compute-skipped grid steps issue no new DMA.
    kv_spec = pl.BlockSpec((1, 1, tk, d_head),
                           lambda b, h, qi, ki: (b, h, jnp.minimum(qi, ki), 0))
    z_spec = pl.BlockSpec((1, 1, tq, d_head), lambda b, h, qi, ki: (b, h, qi, 0))

    bytes_b = (tq * d_head * 2 + 2 * tk * d_head * 2 + tq * d_head * 4
               + tq * tk * 4 + 2 * tq * 4 + tq * d_head * 4)

    z_all = pl.pallas_call(
        kernel_b,
        out_shape=jax.ShapeDtypeStruct((B, H, S, d_head), jnp.float32),
        grid=(B, H, S // tq, S // tk),
        in_specs=[q_spec, kv_spec, kv_spec],
        out_specs=z_spec,
        scratch_shapes=[pltpu.VMEM((tq, 1), jnp.float32),       # running max
                        pltpu.VMEM((tq, 1), jnp.float32),       # running sum
                        pltpu.VMEM((tq, d_head), jnp.float32)], # acc
        compiler_params=pltpu.CompilerParams(
            dimension_semantics=("parallel", "parallel", "parallel", "arbitrary"),
            vmem_limit_bytes=_vmem_limit(bytes_b)),
    )(q_all, k_all, v_all)

    # ---------------- stage C: output projection (sum over heads) ----------------
    tr_c = _pick_tile(S, (256, 128, 64, 32, 16, 8))
    tn_c = _pick_tile(dm_pad, (512, 256, 128))
    z_c_spec = pl.BlockSpec((1, 1, tr_c, d_head), lambda b, si, n, h: (b, h, si, 0))
    wo_spec = pl.BlockSpec((1, d_head, tn_c), lambda b, si, n, h: (h, 0, n))
    bo_spec = pl.BlockSpec((1, tn_c), lambda b, si, n, h: (0, n))
    o_spec = pl.BlockSpec((1, tr_c, tn_c), lambda b, si, n, h: (b, si, n))

    bytes_c = (tr_c * d_head * 4 + d_head * tn_c * 4 + tn_c * 4 + tr_c * tn_c * 4)

    out = pl.pallas_call(
        _out_proj_kernel,
        out_shape=jax.ShapeDtypeStruct((B, S, dm_pad), jnp.float32),
        grid=(B, S // tr_c, dm_pad // tn_c, H),
        in_specs=[z_c_spec, wo_spec, bo_spec],
        out_specs=o_spec,
        compiler_params=pltpu.CompilerParams(
            dimension_semantics=("parallel", "parallel", "parallel", "arbitrary"),
            vmem_limit_bytes=_vmem_limit(bytes_c)),
    )(z_all, wo, bo)

    return out[..., :d_model]


# ---------------- reference (plain JAX, module semantics) ----------------

def attention_reference(qx, kx, vx, W_Q, W_K, W_V, W_O, b_Q, b_K, b_V, b_O,
                        *, use_attn_scale=True):
    B, S, d_model = qx.shape
    H, _, d_head = W_Q.shape
    scale = jnp.sqrt(jnp.float32(d_head)) if use_attn_scale else 1.0
    qx8, kx8, vx8 = _fp8_roundtrip_f32(qx), _fp8_roundtrip_f32(kx), _fp8_roundtrip_f32(vx)
    wq8, wk8, wv8 = _fp8_roundtrip_f32(W_Q), _fp8_roundtrip_f32(W_K), _fp8_roundtrip_f32(W_V)
    q = jnp.einsum('bpm,hmd->bphd', qx8, wq8) + b_Q
    k = jnp.einsum('bpm,hmd->bphd', kx8, wk8) + b_K
    v = jnp.einsum('bpm,hmd->bphd', vx8, wv8) + b_V
    scores = jnp.einsum('bqhd,bkhd->bhqk', q, k) / scale
    mask = jnp.tril(jnp.ones((S, S), dtype=bool))
    scores = jnp.where(mask[None, None], scores, -1000.0)
    pattern = jax.nn.softmax(scores, axis=-1)
    z = jnp.einsum('bkhd,bhqk->bqhd', v, pattern)
    return jnp.einsum('bqhd,hdm->bqm', z, W_O) + b_O


# ---------------- main ----------------

if __name__ == "__main__":
    # Small config consistent with the module: B=2, seq=8, d_model=32,
    # n_heads=4, d_head=8, n_ctx=8, global causal attention, f32.
    B, S, d_model, H, d_head = 2, 8, 32, 4, 8

    key = jax.random.PRNGKey(0)
    ks = jax.random.split(key, 8)
    scale = 0.2
    query_input = jax.random.normal(ks[0], (B, S, d_model), jnp.float32)
    key_input   = jax.random.normal(ks[1], (B, S, d_model), jnp.float32)
    value_input = jax.random.normal(ks[2], (B, S, d_model), jnp.float32)
    W_Q = scale * jax.random.normal(ks[3], (H, d_model, d_head), jnp.float32)
    W_K = scale * jax.random.normal(ks[4], (H, d_model, d_head), jnp.float32)
    W_V = scale * jax.random.normal(ks[5], (H, d_model, d_head), jnp.float32)
    W_O = scale * jax.random.normal(ks[6], (H, d_head, d_model), jnp.float32)
    b_Q = 0.1 * jax.random.normal(ks[7], (H, d_head), jnp.float32)
    b_K = jnp.zeros((H, d_head), jnp.float32)
    b_V = 0.05 * jnp.ones((H, d_head), jnp.float32)
    b_O = jnp.zeros((d_model,), jnp.float32)

    out = attention_forward(query_input, key_input, value_input,
                            W_Q, W_K, W_V, W_O, b_Q, b_K, b_V, b_O)
    out = jax.block_until_ready(out)

    ref = attention_reference(query_input, key_input, value_input,
                              W_Q, W_K, W_V, W_O, b_Q, b_K, b_V, b_O)
    assert out.shape == (B, S, d_model)
    # bf16 q/k/v matmul operands + approx reciprocal => tolerance looser than pure f32.
    max_diff = float(jnp.max(jnp.abs(out - ref)))
    assert jnp.allclose(out, ref, atol=5e-2, rtol=5e-2), max_diff
    print("KERNEL_OK")
</pallas_src>

<mosaic_0001>
module attributes {stable_mosaic.version = 11 : i64} {
  func.func @_qkv_proj_kernel(%arg0: i32, %arg1: i32, %arg2: i32, %arg3: memref<1x8x128xbf16, #tpu.memory_space<vmem>>, %arg4: memref<1x8x128xbf16, #tpu.memory_space<vmem>>, %arg5: memref<1x8x128xbf16, #tpu.memory_space<vmem>>, %arg6: memref<1x128x8xbf16, #tpu.memory_space<vmem>>, %arg7: memref<1x128x8xbf16, #tpu.memory_space<vmem>>, %arg8: memref<1x128x8xbf16, #tpu.memory_space<vmem>>, %arg9: memref<1x1x8xf32, #tpu.memory_space<vmem>>, %arg10: memref<1x1x8xf32, #tpu.memory_space<vmem>>, %arg11: memref<1x1x8xf32, #tpu.memory_space<vmem>>, %arg12: memref<1x1x8x8xbf16, #tpu.memory_space<vmem>>, %arg13: memref<1x1x8x8xbf16, #tpu.memory_space<vmem>>, %arg14: memref<1x1x8x8xbf16, #tpu.memory_space<vmem>>) attributes {dimension_semantics = [#tpu.dimension_semantics<parallel>, #tpu.dimension_semantics<parallel>, #tpu.dimension_semantics<arbitrary>], iteration_bounds = array<i64: 2, 1, 4>, scalar_prefetch = 0 : i64, scratch_operands = 0 : i64, tpu.core_type = #tpu.core_type<tc>, window_params = [{transform_indices = @transform_0, window_bounds = array<i64: 1, 8, 128>}, {transform_indices = @transform_1, window_bounds = array<i64: 1, 8, 128>}, {transform_indices = @transform_2, window_bounds = array<i64: 1, 8, 128>}, {transform_indices = @transform_3, window_bounds = array<i64: 1, 128, 8>}, {transform_indices = @transform_4, window_bounds = array<i64: 1, 128, 8>}, {transform_indices = @transform_5, window_bounds = array<i64: 1, 128, 8>}, {transform_indices = @transform_6, window_bounds = array<i64: 1, 1, 8>}, {transform_indices = @transform_7, window_bounds = array<i64: 1, 1, 8>}, {transform_indices = @transform_8, window_bounds = array<i64: 1, 1, 8>}, {transform_indices = @transform_9, window_bounds = array<i64: 1, 1, 8, 8>}, {transform_indices = @transform_10, window_bounds = array<i64: 1, 1, 8, 8>}, {transform_indices = @transform_11, window_bounds = array<i64: 1, 1, 8, 8>}]} {
    %c0 = arith.constant 0 : index
    %c0_0 = arith.constant 0 : index
    %c0_1 = arith.constant 0 : index
    %0 = vector.load %arg3[%c0, %c0_0, %c0_1] : memref<1x8x128xbf16, #tpu.memory_space<vmem>>, vector<1x8x128xbf16>
    %1 = vector.shape_cast %0 : vector<1x8x128xbf16> to vector<8x128xbf16>
    %c0_2 = arith.constant 0 : index
    %c0_3 = arith.constant 0 : index
    %c0_4 = arith.constant 0 : index
    %2 = vector.load %arg6[%c0_2, %c0_3, %c0_4] : memref<1x128x8xbf16, #tpu.memory_space<vmem>>, vector<1x128x8xbf16>
    %3 = vector.shape_cast %2 : vector<1x128x8xbf16> to vector<128x8xbf16>
    %cst = arith.constant dense<0.000000e+00> : vector<8x8xf32>
    %4 = tpu.matmul %1, %3, %cst {dimension_numbers = #tpu.dot_dimension_numbers<[1], [0], [0], [1], [0, 0, 1, 1], [], []>} : vector<8x128xbf16>, vector<128x8xbf16>, vector<8x8xf32> -> vector<8x8xf32>
    %c0_5 = arith.constant 0 : index
    %c0_6 = arith.constant 0 : index
    %c0_7 = arith.constant 0 : index
    %5 = vector.load %arg9[%c0_5, %c0_6, %c0_7] : memref<1x1x8xf32, #tpu.memory_space<vmem>>, vector<1x1x8xf32>
    %6 = vector.shape_cast %5 : vector<1x1x8xf32> to vector<1x8xf32>
    %7 = vector.broadcast %6 : vector<1x8xf32> to vector<8x8xf32>
    %8 = arith.addf %4, %7 : vector<8x8xf32>
    %c0_8 = arith.constant 0 : index
    %c0_9 = arith.constant 0 : index
    %c0_10 = arith.constant 0 : index
    %9 = vector.load %arg4[%c0_8, %c0_9, %c0_10] : memref<1x8x128xbf16, #tpu.memory_space<vmem>>, vector<1x8x128xbf16>
    %10 = vector.shape_cast %9 : vector<1x8x128xbf16> to vector<8x128xbf16>
    %c0_11 = arith.constant 0 : index
    %c0_12 = arith.constant 0 : index
    %c0_13 = arith.constant 0 : index
    %11 = vector.load %arg7[%c0_11, %c0_12, %c0_13] : memref<1x128x8xbf16, #tpu.memory_space<vmem>>, vector<1x128x8xbf16>
    %12 = vector.shape_cast %11 : vector<1x128x8xbf16> to vector<128x8xbf16>
    %cst_14 = arith.constant dense<0.000000e+00> : vector<8x8xf32>
    %13 = tpu.matmul %10, %12, %cst_14 {dimension_numbers = #tpu.dot_dimension_numbers<[1], [0], [0], [1], [0, 0, 1, 1], [], []>} : vector<8x128xbf16>, vector<128x8xbf16>, vector<8x8xf32> -> vector<8x8xf32>
    %c0_15 = arith.constant 0 : index
    %c0_16 = arith.constant 0 : index
    %c0_17 = arith.constant 0 : index
    %14 = vector.load %arg10[%c0_15, %c0_16, %c0_17] : memref<1x1x8xf32, #tpu.memory_space<vmem>>, vector<1x1x8xf32>
    %15 = vector.shape_cast %14 : vector<1x1x8xf32> to vector<1x8xf32>
    %16 = vector.broadcast %15 : vector<1x8xf32> to vector<8x8xf32>
    %17 = arith.addf %13, %16 : vector<8x8xf32>
    %c0_18 = arith.constant 0 : index
    %c0_19 = arith.constant 0 : index
    %c0_20 = arith.constant 0 : index
    %18 = vector.load %arg5[%c0_18, %c0_19, %c0_20] : memref<1x8x128xbf16, #tpu.memory_space<vmem>>, vector<1x8x128xbf16>
    %19 = vector.shape_cast %18 : vector<1x8x128xbf16> to vector<8x128xbf16>
    %c0_21 = arith.constant 0 : index
    %c0_22 = arith.constant 0 : index
    %c0_23 = arith.constant 0 : index
    %20 = vector.load %arg8[%c0_21, %c0_22, %c0_23] : memref<1x128x8xbf16, #tpu.memory_space<vmem>>, vector<1x128x8xbf16>
    %21 = vector.shape_cast %20 : vector<1x128x8xbf16> to vector<128x8xbf16>
    %cst_24 = arith.constant dense<0.000000e+00> : vector<8x8xf32>
    %22 = tpu.matmul %19, %21, %cst_24 {dimension_numbers = #tpu.dot_dimension_numbers<[1], [0], [0], [1], [0, 0, 1, 1], [], []>} : vector<8x128xbf16>, vector<128x8xbf16>, vector<8x8xf32> -> vector<8x8xf32>
    %c0_25 = arith.constant 0 : index
    %c0_26 = arith.constant 0 : index
    %c0_27 = arith.constant 0 : index
    %23 = vector.load %arg11[%c0_25, %c0_26, %c0_27] : memref<1x1x8xf32, #tpu.memory_space<vmem>>, vector<1x1x8xf32>
    %24 = vector.shape_cast %23 : vector<1x1x8xf32> to vector<1x8xf32>
    %25 = vector.broadcast %24 : vector<1x8xf32> to vector<8x8xf32>
    %26 = arith.addf %22, %25 : vector<8x8xf32>
    %27 = arith.truncf %8 : vector<8x8xf32> to vector<8x8xbf16>
    %c0_28 = arith.constant 0 : index
    %c0_29 = arith.constant 0 : index
    %c0_30 = arith.constant 0 : index
    %c0_31 = arith.constant 0 : index
    %28 = vector.load %arg12[%c0_28, %c0_29, %c0_30, %c0_31] : memref<1x1x8x8xbf16, #tpu.memory_space<vmem>>, vector<1x1x8x8xbf16>
    %29 = vector.shape_cast %28 : vector<1x1x8x8xbf16> to vector<8x8xbf16>
    %30 = vector.shape_cast %27 : vector<8x8xbf16> to vector<1x1x8x8xbf16>
    tpu.vector_store %arg12[%c0_28, %c0_29, %c0_30, %c0_31], %30 {strides = array<i32>} : memref<1x1x8x8xbf16, #tpu.memory_space<vmem>>, vector<1x1x8x8xbf16>,
    %31 = arith.truncf %17 : vector<8x8xf32> to vector<8x8xbf16>
    %c0_32 = arith.constant 0 : index
    %c0_33 = arith.constant 0 : index
    %c0_34 = arith.constant 0 : index
    %c0_35 = arith.constant 0 : index
    %32 = vector.load %arg13[%c0_32, %c0_33, %c0_34, %c0_35] : memref<1x1x8x8xbf16, #tpu.memory_space<vmem>>, vector<1x1x8x8xbf16>
    %33 = vector.shape_cast %32 : vector<1x1x8x8xbf16> to vector<8x8xbf16>
    %34 = vector.shape_cast %31 : vector<8x8xbf16> to vector<1x1x8x8xbf16>
    tpu.vector_store %arg13[%c0_32, %c0_33, %c0_34, %c0_35], %34 {strides = array<i32>} : memref<1x1x8x8xbf16, #tpu.memory_space<vmem>>, vector<1x1x8x8xbf16>,
    %35 = arith.truncf %26 : vector<8x8xf32> to vector<8x8xbf16>
    %c0_36 = arith.constant 0 : index
    %c0_37 = arith.constant 0 : index
    %c0_38 = arith.constant 0 : index
    %c0_39 = arith.constant 0 : index
    %36 = vector.load %arg14[%c0_36, %c0_37, %c0_38, %c0_39] : memref<1x1x8x8xbf16, #tpu.memory_space<vmem>>, vector<1x1x8x8xbf16>
    %37 = vector.shape_cast %36 : vector<1x1x8x8xbf16> to vector<8x8xbf16>
    %38 = vector.shape_cast %35 : vector<8x8xbf16> to vector<1x1x8x8xbf16>
    tpu.vector_store %arg14[%c0_36, %c0_37, %c0_38, %c0_39], %38 {strides = array<i32>} : memref<1x1x8x8xbf16, #tpu.memory_space<vmem>>, vector<1x1x8x8xbf16>,
    return
  }
  func.func @transform_0(%arg0: i32, %arg1: i32, %arg2: i32) -> (i32, i32, i32) {
    %c0_i32 = arith.constant 0 : i32
    %c0_i32_0 = arith.constant 0 : i32
    return %arg0, %arg1, %c0_i32 : i32, i32, i32
  }
  func.func @transform_1(%arg0: i32, %arg1: i32, %arg2: i32) -> (i32, i32, i32) {
    %c0_i32 = arith.constant 0 : i32
    %c0_i32_0 = arith.constant 0 : i32
    return %arg0, %arg1, %c0_i32 : i32, i32, i32
  }
  func.func @transform_2(%arg0: i32, %arg1: i32, %arg2: i32) -> (i32, i32, i32) {
    %c0_i32 = arith.constant 0 : i32
    %c0_i32_0 = arith.constant 0 : i32
    return %arg0, %arg1, %c0_i32 : i32, i32, i32
  }
  func.func @transform_3(%arg0: i32, %arg1: i32, %arg2: i32) -> (i32, i32, i32) {
    %c0_i32 = arith.constant 0 : i32
    %c0_i32_0 = arith.constant 0 : i32
    %c0_i32_1 = arith.constant 0 : i32
    return %arg2, %c0_i32, %c0_i32_0 : i32, i32, i32
  }
  func.func @transform_4(%arg0: i32, %arg1: i32, %arg2: i32) -> (i32, i32, i32) {
    %c0_i32 = arith.constant 0 : i32
    %c0_i32_0 = arith.constant 0 : i32
    %c0_i32_1 = arith.constant 0 : i32
    return %arg2, %c0_i32, %c0_i32_0 : i32, i32, i32
  }
  func.func @transform_5(%arg0: i32, %arg1: i32, %arg2: i32) -> (i32, i32, i32) {
    %c0_i32 = arith.constant 0 : i32
    %c0_i32_0 = arith.constant 0 : i32
    %c0_i32_1 = arith.constant 0 : i32
    return %arg2, %c0_i32, %c0_i32_0 : i32, i32, i32
  }
  func.func @transform_6(%arg0: i32, %arg1: i32, %arg2: i32) -> (i32, i32, i32) {
    %c0_i32 = arith.constant 0 : i32
    %c0_i32_0 = arith.constant 0 : i32
    %c0_i32_1 = arith.constant 0 : i32
    return %arg2, %c0_i32, %c0_i32_0 : i32, i32, i32
  }
  func.func @transform_7(%arg0: i32, %arg1: i32, %arg2: i32) -> (i32, i32, i32) {
    %c0_i32 = arith.constant 0 : i32
    %c0_i32_0 = arith.constant 0 : i32
    %c0_i32_1 = arith.constant 0 : i32
    return %arg2, %c0_i32, %c0_i32_0 : i32, i32, i32
  }
  func.func @transform_8(%arg0: i32, %arg1: i32, %arg2: i32) -> (i32, i32, i32) {
    %c0_i32 = arith.constant 0 : i32
    %c0_i32_0 = arith.constant 0 : i32
    %c0_i32_1 = arith.constant 0 : i32
    return %arg2, %c0_i32, %c0_i32_0 : i32, i32, i32
  }
  func.func @transform_9(%arg0: i32, %arg1: i32, %arg2: i32) -> (i32, i32, i32, i32) {
    %c0_i32 = arith.constant 0 : i32
    %c0_i32_0 = arith.constant 0 : i32
    return %arg0, %arg2, %arg1, %c0_i32 : i32, i32, i32, i32
  }
  func.func @transform_10(%arg0: i32, %arg1: i32, %arg2: i32) -> (i32, i32, i32, i32) {
    %c0_i32 = arith.constant 0 : i32
    %c0_i32_0 = arith.constant 0 : i32
    return %arg0, %arg2, %arg1, %c0_i32 : i32, i32, i32, i32
  }
  func.func @transform_11(%arg0: i32, %arg1: i32, %arg2: i32) -> (i32, i32, i32, i32) {
    %c0_i32 = arith.constant 0 : i32
    %c0_i32_0 = arith.constant 0 : i32
    return %arg0, %arg2, %arg1, %c0_i32 : i32, i32, i32, i32
  }
}

</mosaic_0001>

<bundles_post_ra>
// kernel: tpu_custom_call.1
= control target key start
LH: loop header
LB: loop body
LE: loop exit
PB: predicated region body
PF: predicated region fallthrough
CT: control target
= control target key end

     0   :  { %s1880_s0 = inlined_call_operand.vmem [shape: bf16[2,8,128], index: 0, kind: input, shape index: {}]   ;;  %s1881_s1 = inlined_call_operand.vmem [shape: bf16[2,8,128], index: 1, kind: input, shape index: {}]   ;;  %s1882_s2 = inlined_call_operand.vmem [shape: bf16[2,8,128], index: 2, kind: input, shape index: {}]   ;;  %s1883_s3 = inlined_call_operand.vmem [shape: bf16[4,128,8], index: 3, kind: input, shape index: {}]   ;;  %s1884_s4 = inlined_call_operand.vmem [shape: bf16[4,128,8], index: 4, kind: input, shape index: {}]   ;;  %s1885_s5 = inlined_call_operand.vmem [shape: bf16[4,128,8], index: 5, kind: input, shape index: {}]   ;;  %s1886_s6 = inlined_call_operand.vmem [shape: f32[4,1,8], index: 6, kind: input, shape index: {}]   ;;  %s1887_s7 = inlined_call_operand.vmem [shape: f32[4,1,8], index: 7, kind: input, shape index: {}]   ;;  %s1888_s8 = inlined_call_operand.vmem [shape: f32[4,1,8], index: 8, kind: input, shape index: {}]   ;;  %s1889_s9 = inlined_call_operand.hbm [shape: bf16[2,4,8,8], index: 9, kind: output, shape index: {0}]   ;;  %s1890_s10 = inlined_call_operand.hbm [shape: bf16[2,4,8,8], index: 10, kind: output, shape index: {1}]   ;;  %s1891_s11 = inlined_call_operand.hbm [shape: bf16[2,4,8,8], index: 11, kind: output, shape index: {2}]  }
   0x1   :  { %1900 = sst [smem:[#allocation14_spill]] %s1880_s0 }
   0x2   :  { %1901 = sst [smem:[#allocation15_spill]] %s1881_s1 }
   0x3   :  { %1902 = sst [smem:[#allocation16_spill]] %s1882_s2 }
   0x4   :  { %1903 = sst [smem:[#allocation17_spill]] %s1883_s3 }
   0x5   :  { %1904 = sst [smem:[#allocation18_spill]] %s1884_s4 }
   0x6   :  { %1905 = sst [smem:[#allocation19_spill]] %s1885_s5 }
   0x7   :  { %17 = vsyncpa [#allocation3], 0 }
   0x8   :  { %19 = vsyncpa [#allocation3 + $0x1], 0 }
   0x9   :  { %20 = vsyncpa [#allocation5], 0 }
   0xa   :  { %22 = vsyncpa [#allocation5 + $0x1], 0  ;;  %s1608_s17 = smov 0   ;;  %s1610_s18 = smov 0  }
   0xb   :  { %s1612_s19 = smov 0   ;;  %s1614_s20 = smov 0  }
   0xc   :  { %s1616_s21 = smov 0   ;;  %s1618_s22 = smov 0  }
   0xd   :  { %s1620_s23 = smov 0   ;;  %s1622_s24 = smov 0  }
   0xe LB: > { %1906 = sst [smem:[#allocation9_spill]] %s1538_s22  ;;  %s1893_s25 = sadd.s32 4294967295, %s1546_s24   ;;  %s1546_s24 = sphi %s1622_s24, %s28_s24   ;;  %s1542_s23 = sphi %s1620_s23, %s1927_s23   ;;  %s1538_s22 = sphi %s1618_s22, %s1926_s22   ;;  %s1534_s21 = sphi %s1616_s21, %s1925_s21   ;;  %s1530_s20 = sphi %s1614_s20, %s1924_s20   ;;  %s1526_s19 = sphi %s1612_s19, %s1930_s19   ;;  %s1522_s18 = sphi %s1610_s18, %s1929_s18   ;;  %s1518_s17 = sphi %s1608_s17, %s1928_s17  }
   0xf   : > { %1907 = sst [smem:[#allocation10_spill]] %s1542_s23  ;;  %s1892_s26 = sadd.s32 4294967294, %s1546_s24  }
  0x10   : > { %s40_s27 = sadd.s32 1, %s1538_s22  ;;  %s47_s28 = sadd.s32 1, %s1542_s23 }
  0x11   : > { %p41_p0 = scmp.ge.s32.totalorder %s40_s27, 4  ;;  %p308_p1 = scmp.ne.s32.totalorder %s1526_s19, %s1522_s18 }
  0x12   : > { %p309_p2 = scmp.eq.s32.totalorder %s1893_s25, 7  ;;  %p314_p5 = scmp.ne.s32.totalorder %s1522_s18, %s1518_s17 }
  0x13   : > { %s1932_s27 = smov (%p41_p0, %s40_s27), 0  ;;  %s1934_s28 = smov (!%p41_p0, %s47_s28), %s1542_s23 }
  0x14   : > { %1908 = sst [smem:[#allocation11_spill]] %s1932_s27  ;;  %s292_s29 = ssub.s32 %s1538_s22, %s1932_s27 }
  0x15   : > { %p1661_p3 = por %p309_p2, %p308_p1  ;;  %p49_p4 = scmp.ge.s32.totalorder %s1934_s28, 2 }
  0x16   : > { %p315_p6 = scmp.eq.s32.totalorder %s1892_s26, 7  ;;  %p1161_p7 = scmp.ge.s32.totalorder %s1546_s24, 1 }
  0x17   : > { %s1936_s28 = smov (%p49_p4, %s1934_s28), 0  ;;  %p465_p9 = scmp.lt.s32.totalorder %s1546_s24, 9 }
  0x18   : > { %1910 = sst [smem:[#allocation12_spill]] %s1936_s28  ;;  %p1672_p8 = por %p315_p6, %p314_p5 }
  0x19   : > { %s291_s13 = ssub.s32 %s1542_s23, %s1936_s28  ;;  %s298_s14 = sadd.s32 1, %s1526_s19 }
  0x1a   : > { %s1911_s12 = scalar_select %p1672_p8, 1, 0 }
  0x1b   : > { %s293_s15 = sor.u32 %s292_s29, %s291_s13  ;;  %p466_p10 = pnand %p1161_p7, %p465_p9 }
  0x1c   : > { %1912 = sst [smem:[#allocation13_spill]] %s1911_s12  ;;  %p296_p11 = scmp.eq.s32.totalorder %s293_s15, 0 }
  0x1d   : > { %469 = sbr.rel (%p466_p10) target bundleno = 228 (0xe4), region = 56  ;;  %p576_p12 = scmp.lt.s32.totalorder (!%p466_p10), %s1530_s20, 3 }
  0x1e   : > { %s1681_s16 = scalar_select %p296_p11, %s1526_s19, %s298_s14  }
  0x1f   : > { %s1913_s3 = sld [smem:[#allocation17_spill]] (!%p466_p10)  ;;  %p555_p13 = scmp.lt.s32.totalorder (!%p466_p10), %s1534_s21, 1 }
  0x20   : > { %s1914_s4 = sld [smem:[#allocation18_spill]] (!%p466_p10)  ;;  %s1899_s27 = sand.u32 (!%p466_p10), 1, %s1522_s18  }
  0x21   : > { %s1915_s5 = sld [smem:[#allocation19_spill]] (!%p466_p10) }
  0x22   : > { %s1685_s26 = scalar_select %p576_p12, %s1530_s20, 3  ;;  %vm847_vm0 = vcmask 60416  }
  0x23   : > { %s556_s23 = scalar_select %p555_p13, %s1534_s21, 1 }
  0x24   : > { %s1281_s25 = sshll.u32 %s1685_s26, 6  ;;  %s1916_s0 = sld [smem:[#allocation14_spill]] }
  0x25   : > { %s1695_s29 = scalar_lea.vmem %s1913_s3, %s1281_s25  ;;  %s1917_s1 = sld [smem:[#allocation15_spill]] }
  0x26   : > { %s1700_s15 = scalar_lea.vmem %s1914_s4, %s1281_s25  ;;  %v1291_v0 = vld [vmem:[%s1695_s29 + $0x38] sm:$0xff]  ;;  %v1290_v3 = vld [vmem:[%s1695_s29 + $0x30] sm:$0xff]  ;;  %v1289_v6 = vld [vmem:[%s1695_s29 + $0x28] sm:$0xff]  ;;  %s1918_s2 = sld [smem:[#allocation16_spill]] }
  0x27   : > { %v1299_v1 = vld [vmem:[%s1700_s15 + $0x38] sm:$0xff]  ;;  %s1707_s12 = scalar_lea.vmem %s1915_s5, %s1281_s25  ;;  %669 = vmatpush.bf16.msra.mxu0 %v1291_v0  ;;  %v1298_v4 = vld [vmem:[%s1700_s15 + $0x30] sm:$0xff]  ;;  %v1297_v7 = vld [vmem:[%s1700_s15 + $0x28] sm:$0xff]  ;;  %s1165_s25 = sshll.u32 %s556_s23, 2 }
  0x28   : > { %v1307_v2 = vld [vmem:[%s1707_s12 + $0x38] sm:$0xff]  ;;  %751 = vmatpush.bf16.msra.mxu1 %v1299_v1  ;;  %v1306_v5 = vld [vmem:[%s1707_s12 + $0x30] sm:$0xff]  ;;  %v1305_v8 = vld [vmem:[%s1707_s12 + $0x28] sm:$0xff]  ;;  %s596_s28 = scalar_lea.vmem %s1887_s7, %s1685_s26  ;;  %s599_s4 = scalar_lea.vmem %s1888_s8, %s1685_s26 }
  0x29   : > { %833 = vmatpush.bf16.msra.mxu2 %v1307_v2  ;;  %v1288_v9 = vld [vmem:[%s1695_s29 + $0x20] sm:$0xff]  ;;  %v1287_v12 = vld [vmem:[%s1695_s29 + $0x18] sm:$0xff]  ;;  %v1286_v15 = vld [vmem:[%s1695_s29 + $0x10] sm:$0xff] }
  0x2a   : > { %v1296_v10 = vld [vmem:[%s1700_s15 + $0x20] sm:$0xff]  ;;  %v1295_v13 = vld [vmem:[%s1700_s15 + $0x18] sm:$0xff]  ;;  %v1294_v16 = vld [vmem:[%s1700_s15 + $0x10] sm:$0xff]  ;;  %s561_s14 = scalar_lea.vmem %s1916_s0, %s1165_s25 }
  0x2b   : > { %670 = vmatpush.bf16.msra.mxu0 %v1290_v3  ;;  %v1304_v11 = vld [vmem:[%s1707_s12 + $0x20] sm:$0xff]  ;;  %v1303_v14 = vld [vmem:[%s1707_s12 + $0x18] sm:$0xff]  ;;  %v1302_v17 = vld [vmem:[%s1707_s12 + $0x10] sm:$0xff]  ;;  %s568_s3 = scalar_lea.vmem %s1917_s1, %s1165_s25 }
  0x2c   : > { %752 = vmatpush.bf16.msra.mxu1 %v1298_v4  ;;  %v1285_v18 = vld [vmem:[%s1695_s29 + $0x8] sm:$0xff]  ;;  %v1284_v21 = vld [vmem:[%s1695_s29] sm:$0xff]  ;;  %s575_s29 = scalar_lea.vmem %s1918_s2, %s1165_s25  ;;  %s1273_s25 = sshll.u32 %s1534_s21, 2 }
  0x2d   : > { %834 = vmatpush.bf16.msra.mxu2 %v1306_v5  ;;  %v1293_v19 = vld [vmem:[%s1700_s15 + $0x8] sm:$0xff]  ;;  %v1292_v22 = vld [vmem:[%s1700_s15] sm:$0xff]  ;;  %s875_s23 = sadd.s32 %s1530_s20, %s1273_s25  ;;  %s1920_s15 = sadd.s32 4294967295, %s1546_s24  }
  0x2e   : > { %v1301_v20 = vld [vmem:[%s1707_s12 + $0x8] sm:$0xff]  ;;  %v1300_v23 = vld [vmem:[%s1707_s12] sm:$0xff]  ;;  %s1919_s12 = scalar_lea.vmem %s1886_s6, %s1685_s26  ;;  %s1764_s1 = sand.u32 1, %s1920_s15  }
  0x2f   : > { %671 = vmatpush.bf16.msra.mxu0 %v1289_v6  ;;  %v600_v24 = vld [vmem:[%s561_s14] sm:$0xf]  ;;  %s1755_s14 = sshll.u32 %s1899_s27, 2 }
  0x30   : > { %753 = vmatpush.bf16.msra.mxu1 %v1297_v7  ;;  %v682_v25 = vld [vmem:[%s568_s3] sm:$0xf]  ;;  %s1274_s3 = sshll.u32 %s875_s23, 2  ;;  %s547_s2 = scalar_lea.vmem [#allocation4], %s1755_s14 }
  0x31   : > { %835 = vmatpush.bf16.msra.mxu2 %v1305_v8  ;;  %v764_v26 = vld [vmem:[%s575_s29] sm:$0xf]  ;;  %s894_s20 = scalar_lea.hbm %s1890_s10, %s1274_s3  ;;  %s877_s27 = scalar_lea.hbm %s1889_s9, %s1274_s3 }
  0x32   : > { %v1389_v27 = vld [vmem:[%s1919_s12] ss:$0 sm:$0xff]  ;;  %s1773_s5 = sshll.u32 %s547_s2, 4  ;;  %s1775_s0 = sshll.u32 %s894_s20, 4  ;;  %s897_s5 = int_to_ptr.vmem [resolvable:$true] %s1773_s5  ;;  %s899_s0 = int_to_ptr.hbm [resolvable:$true] %s1775_s0 }
  0x33   : > { %672 = vmatpush.bf16.msra.mxu0 %v1288_v9  ;;  %v1390_v28 = vld [vmem:[%s596_s28] ss:$0 sm:$0xff]  ;;  %s540_s26 = scalar_lea.vmem [#allocation2], %s1755_s14  ;;  %s1782_s23 = sshll.u32 %s877_s27, 4  ;;  %s882_s23 = int_to_ptr.hbm [resolvable:$true] %s1782_s23 }
  0x34   : > { %754 = vmatpush.bf16.msra.mxu1 %v1296_v10  ;;  %s1780_s28 = sshll.u32 %s540_s26, 4  ;;  %s911_s15 = scalar_lea.hbm %s1891_s11, %s1274_s3  ;;  %v1391_v35 = vld [vmem:[%s599_s4] ss:$0 sm:$0xff]  ;;  %s880_s28 = int_to_ptr.vmem [resolvable:$true] %s1780_s28 }
  0x35   : > { %836 = vmatpush.bf16.msra.mxu2 %v1304_v11  ;;  %s554_s13 = scalar_lea.vmem [#allocation6], %s1755_s14  ;;  %s1797_s21 = sshll.u32 %s911_s15, 4  ;;  %s916_s21 = int_to_ptr.hbm [resolvable:$true] %s1797_s21 }
  0x36   : > { %s1795_s27 = sshll.u32 %s554_s13, 4  ;;  %s859_s20 = scalar_lea.sflag [#allocation5], %s1764_s1  ;;  %s914_s27 = int_to_ptr.vmem [resolvable:$true] %s1795_s27 }
  0x37   : > { %673 = vmatpush.bf16.msra.mxu0 %v1287_v12  ;;  %s1406_s22 = sshra.s32 %s899_s0, 4  ;;  %s1412_s29 = scalar_lea.hbm %s1890_s10, 32  ;;  %s1407_s22 = int_to_ptr.hbm [resolvable:$true] %s1406_s22 }
  0x38   : > { %755 = vmatpush.bf16.msra.mxu1 %v1295_v13  ;;  %s1408_s25 = scalar_lea.hbm %s1407_s22, 4  ;;  %p1413_p4 = scmp.lt.s32.totalorder %s1407_s22, %s1890_s10 }
  0x39   : > { %837 = vmatpush.bf16.msra.mxu2 %v1303_v14  ;;  %p1409_p0 = scmp.ne.s32.totalorder %s1407_s22, %s1408_s25  ;;  %p1414_p5 = scmp.lt.s32.totalorder %s1412_s29, %s1408_s25 }
  0x3b   : > { %674 = vmatpush.bf16.msra.mxu0 %v1286_v15  ;;  %p1410_p1 = pnand %p1409_p0, %p1661_p3  ;;  %p1415_p6 = por %p1414_p5, %p1413_p4 }
  0x3c   : > { %756 = vmatpush.bf16.msra.mxu1 %v1294_v16 }
  0x3d   : > { %838 = vmatpush.bf16.msra.mxu2 %v1302_v17  ;;  %p1411_p2 = pneg %p1410_p1 }
  0x3f   : > { %675 = vmatpush.bf16.msra.mxu0 %v1285_v18  ;;  %p1416_p7 = pnand %p1415_p6, %p1411_p2 }
  0x40   : > { %757 = vmatpush.bf16.msra.mxu1 %v1293_v19 }
  0x41   : > { %839 = vmatpush.bf16.msra.mxu2 %v1301_v20 }
  0x43   : > { %676 = vmatpush.bf16.msra.mxu0 %v1284_v21 }
  0x44   : > { %758 = vmatpush.bf16.msra.mxu1 %v1292_v22 }
  0x45   : > { %840 = vmatpush.bf16.msra.mxu2 %v1300_v23 }
  0x46   : > { %677 = vmatmul.bf16.vlgmr.msra.gmra.mxu0 %v600_v24 }
  0x47   : > { %759 = vmatmul.bf16.vlgmr.msra.gmra.mxu1 %v682_v25 }
  0x48   : > { %841 = vmatmul.bf16.vlgmr.msra.gmra.mxu2 %v764_v26 }
  0xc3   : > { %v678_v29 = vpop.f32.mrf.mxu0 }
  0xc4   : > { %v760_v30 = vpop.f32.mrf.mxu1  ;;  %v679_v31 = vadd.f32 %v1389_v27, %v678_v29 }
  0xc5   : > { %v761_v32 = vadd.f32 %v1390_v28, %v760_v30 }
  0xc6   : > { %v846_v33 = vpack.c.bf16 %v679_v31, %v679_v31 }
  0xc7   : > { %v849_v34 = vpack.c.bf16 %v761_v32, %v761_v32 }
  0xc9   : > { %850 = vst.msk [vmem:[%s547_s2] sm:$0xf] %vm847_vm0, %v849_v34 }
  0xca   : > { %1419 = shalt.err (!%p1416_p7)
}
  0xcb   : > { %1309 = dma.vmem_to_hbm [thread:$0]  (%p1661_p3), %s897_s5, 64, %s899_s0, %s859_s20   ;;  %848 = vst.msk [vmem:[%s540_s26] sm:$0xf] %vm847_vm0, %v846_v33  ;;  %v842_v36 = vpop.f32.mrf.mxu2 }
  0xcc   : > { %s1921_s15 = sand.u32 1, %s1522_s18   ;;  %s1434_s22 = sshra.s32 %s882_s23, 4  ;;  %s1435_s22 = int_to_ptr.hbm [resolvable:$true] %s1434_s22 }
  0xcd   : > { %s854_s3 = scalar_lea.sflag [#allocation3], %s1921_s15  ;;  %s1436_s25 = scalar_lea.hbm %s1435_s22, 4 }
  0xce   : > { %p1437_p9 = scmp.ne.s32.totalorder %s1435_s22, %s1436_s25  ;;  %s1440_s12 = scalar_lea.hbm %s1889_s9, 32 }
  0xcf   : > { %p1441_p12 = scmp.lt.s32.totalorder %s1435_s22, %s1889_s9  ;;  %p1442_p13 = scmp.lt.s32.totalorder %s1440_s12, %s1436_s25 }
  0xd0   : > { %p1438_p10 = pnand %p1437_p9, %p1661_p3 }
  0xd1   : > { %p1443_p0 = por %p1442_p13, %p1441_p12 }
  0xd2   : > { %p1439_p11 = pneg %p1438_p10 }
  0xd4   : > { %p1444_p1 = pnand %p1443_p0, %p1439_p11 }
  0xd6   : > { %1447 = shalt.err (!%p1444_p1)
}
  0xd7   : > { %1308 = dma.vmem_to_hbm [thread:$0]  (%p1661_p3), %s880_s28, 64, %s882_s23, %s854_s3   ;;  %v843_v37 = vadd.f32 %v1391_v35, %v842_v36  ;;  %v680_v38 = vpop.f32.mrf.mxu0  ;;  %v762_v39 = vpop.f32.mrf.mxu1 }
  0xd8   : > { %s1462_s0 = sshra.s32 %s916_s21, 4  ;;  %s1468_s28 = scalar_lea.hbm %s1891_s11, 32  ;;  %s1463_s0 = int_to_ptr.hbm [resolvable:$true] %s1462_s0 }
  0xd9   : > { %v851_v40 = vpack.c.bf16 %v843_v37, %v843_v37  ;;  %s1464_s26 = scalar_lea.hbm %s1463_s0, 4  ;;  %p1469_p6 = scmp.lt.s32.totalorder %s1463_s0, %s1891_s11 }
  0xda   : > { %p1465_p2 = scmp.ne.s32.totalorder %s1463_s0, %s1464_s26  ;;  %p1470_p7 = scmp.lt.s32.totalorder %s1468_s28, %s1464_s26 }
  0xdb   : > { %852 = vst.msk [vmem:[%s554_s13] sm:$0xf] %vm847_vm0, %v851_v40 }
  0xdc   : > { %p1466_p4 = pnand %p1465_p2, %p1661_p3  ;;  %p1471_p9 = por %p1470_p7, %p1469_p6 }
  0xde   : > { %p1467_p5 = pneg %p1466_p4 }
  0xe0   : > { %p1472_p10 = pnand %p1471_p9, %p1467_p5 }
  0xe2   : > { %1475 = shalt.err (!%p1472_p10)
}
  0xe3   : > { %1310 = dma.vmem_to_hbm [thread:$0]  (%p1661_p3), %s914_s27, 64, %s916_s21, %s859_s20   ;;  %v844_v41 = vpop.f32.mrf.mxu2 }
  0xe4 PF: > { %p1324_p11 = scmp.ge.s32.totalorder %s1546_s24, 2  ;;  %s927_s13 = sand.u32 1, %s1518_s17  }
  0xe5   : > { %s928_s25 = scalar_lea.sflag [#allocation3], %s927_s13 }
  0xe6   : > { %p1315_p12 = pnand %p1324_p11, %p1672_p8 }
  0xe8   : > { %p1316_p13 = pneg %p1315_p12 }
  0xea   : > { %1509 = dma.done.wait (%p1316_p13), %s928_s25, 64  }
  0xeb   : > { %1511 = vsyncadd (%p1316_p13), %s928_s25, 4294967232  ;;  %s1923_s4 = sadd.s32 4294967294, %s1546_s24  }
  0xec   : > { %s937_s29 = sand.u32 1, %s1923_s4  }
  0xed   : > { %s938_s30 = scalar_lea.sflag [#allocation5], %s937_s29 }
  0xee   : > { %1513 = dma.done.wait (%p1316_p13), %s938_s30, 128  }
  0xef   : > { %1515 = vsyncadd (%p1316_p13), %s938_s30, 4294967168  ;;  %s28_s24 = sadd.s32 1, %s1546_s24   ;;  %s1924_s20 = sld [smem:[#allocation9_spill]] }
  0xf0   : > { %p25_p3 = scmp.ge.s32.totalorder %s28_s24, 10   ;;  %s1925_s21 = sld [smem:[#allocation10_spill]] }
  0xf1   : > { %s1926_s22 = sld [smem:[#allocation11_spill]]  ;;  %s1928_s17 = smov %s1522_s18 }
  0xf2   : > { %s1927_s23 = sld [smem:[#allocation12_spill]]  ;;  %s1929_s18 = smov %s1526_s19 }
  0xf3   : > { %s1930_s19 = smov %s1681_s16  ;;  %27 = sbr.rel (!%p25_p3) target bundleno = 14 (0xe), region = 147 }
  0xf8   :  { %954 = vsyncpa [#allocation3], 1 }
  0xf9   :  { %956 = vsyncpa [#allocation3 + $0x1], 1 }
  0xfa   :  { %957 = vsyncpa [#allocation5], 1 }
  0xfb   :  { %959 = vsyncpa [#allocation5 + $0x1], 1 }

</bundles_post_ra>
